<compile_context>
chip_gen: v7x
topology: tpu7x:2x2x1
jax: 0.10.0
libtpu: 0.0.40
codegen_flags: <defaults>
</compile_context>

<pallas_src>
import jax
import jax.numpy as jnp
from jax.experimental import pallas as pl
from jax.experimental.pallas import tpu as pltpu


def _round_up(x, m):
    return ((x + m - 1) // m) * m


def _linear_kernel(x_ref, w_ref, b_ref, o_ref):
    # x_ref: (tm, D) f32, w_ref: (D, tn) f32, b_ref: (1, tn) f32,
    # o_ref: (tm, tn) f32.
    # Cast the MXU operands to bf16 here (VPU cast, hidden under the tile
    # DMA) instead of paying an extra HBM pass in the wrapper; accumulate in
    # f32 on the MXU and do the bias add in f32.
    x_bf = x_ref[...].astype(jnp.bfloat16)
    w_bf = w_ref[...].astype(jnp.bfloat16)
    acc = jnp.dot(x_bf, w_bf, preferred_element_type=jnp.float32)
    o_ref[...] = (acc + b_ref[...]).astype(o_ref.dtype)


@jax.jit
def _linear_2d(x2d, w, b):
    """x2d: (M, D) f32; w: (D, n_cls) f32; b: (n_cls,) f32 -> (M, n_cls) f32."""
    M, D = x2d.shape
    n_cls = w.shape[1]
    b2 = b.reshape(1, n_cls)

    # --- VMEM budget, derived from the actual chip --------------------------
    try:
        vmem_cap = pltpu.get_tpu_info().vmem_capacity_bytes
    except Exception:  # pragma: no cover - conservative fallback
        vmem_cap = 64 * 1024 * 1024
    budget = min(vmem_cap * 3 // 4, 96 * 1024 * 1024)

    # --- row tile ------------------------------------------------------------
    if M >= 2048:
        tm = 1024
    elif M >= 1024:
        tm = 512
    else:
        # Small M: aim for >= 2 row tiles (megacore) with tm a multiple of 8.
        tm = max(8, _round_up(pl.cdiv(M, 2), 8))

    # --- column tile ----------------------------------------------------------
    # Double-buffered f32 tile footprint for x, w, b, out.
    def footprint(tm_, tn_):
        return 2 * 4 * (tm_ * D + D * tn_ + tn_ + tm_ * tn_)

    tn = n_cls  # keep W/bias fully resident; constant column index_map
    if footprint(tm, tn) > budget:
        # Very large class count: fall back to 128-lane-aligned column tiles
        # (the ragged last column tile is masked by Pallas; no padding).
        tn = 512
        while footprint(tm, tn) > budget and tm > 256:
            tm //= 2
        while footprint(tm, tn) > budget and tn > 128:
            tn //= 2

    grid = (pl.cdiv(M, tm), pl.cdiv(n_cls, tn))

    vmem_limit = int(min(budget, max(32 * 1024 * 1024, 2 * footprint(tm, tn))))

    cost = pl.CostEstimate(
        flops=2 * M * D * n_cls,
        transcendentals=0,
        bytes_accessed=M * D * 4 + D * n_cls * 4 + n_cls * 4 + M * n_cls * 4,
    )

    return pl.pallas_call(
        _linear_kernel,
        out_shape=jax.ShapeDtypeStruct((M, n_cls), jnp.float32),
        grid_spec=pl.GridSpec(
            grid=grid,
            in_specs=[
                pl.BlockSpec((tm, D), lambda i, j: (i, 0)),   # x row tile
                pl.BlockSpec((D, tn), lambda i, j: (0, j)),   # weight (resident)
                pl.BlockSpec((1, tn), lambda i, j: (0, j)),   # bias (resident)
            ],
            out_specs=pl.BlockSpec((tm, tn), lambda i, j: (i, j)),
        ),
        compiler_params=pltpu.CompilerParams(
            dimension_semantics=("parallel", "parallel"),
            vmem_limit_bytes=vmem_limit,
        ),
        cost_estimate=cost,
    )(x2d, w, b2)


class DecoderLinearSAPS:
    """JAX/Pallas port of DecoderLinear_SAPS."""

    def __init__(self, n_cls, d_encoder, key):
        self.n_cls = n_cls
        self.d_encoder = d_encoder
        kw, _ = jax.random.split(key)
        # Deterministic synthetic init mirroring nn.Linear(d_encoder, n_cls)
        # shapes (trunc-normal-ish weight, zero bias).
        self.weight = (
            jax.random.truncated_normal(
                kw, -2.0, 2.0, (d_encoder, n_cls), jnp.float32) * 0.02
        )
        self.bias = jnp.zeros((n_cls,), jnp.float32)

    def __call__(self, x_list, im_size):
        # Matches the PyTorch forward: applies the head to every list element;
        # im_size (H, W) is accepted but unused by the computation.
        H, W = im_size  # noqa: F841  (kept for signature parity)
        outs = []
        for xi in x_list:
            B, N, D = xi.shape
            y2d = _linear_2d(xi.reshape(B * N, D), self.weight, self.bias)
            outs.append(y2d.reshape(B, N, self.n_cls))
        return outs


if __name__ == "__main__":
    key = jax.random.PRNGKey(0)
    k_param, k_x0, k_x1 = jax.random.split(key, 3)

    d_encoder = 32
    n_cls = 10
    B, N = 2, 8
    im_size = (16, 16)

    decoder = DecoderLinearSAPS(n_cls, d_encoder, k_param)

    x_list = [
        jax.random.normal(k_x0, (B, N, d_encoder), jnp.float32),
        jax.random.normal(k_x1, (B, N, d_encoder), jnp.float32),
    ]

    outs = decoder(x_list, im_size)
    outs = [jax.block_until_ready(o) for o in outs]

    # Correctness check vs. plain-JAX f32 reference (bf16 MXU operands with
    # f32 accumulation -> allow a small tolerance).
    for xi, oi in zip(x_list, outs):
        ref = xi @ decoder.weight + decoder.bias
        assert oi.shape == (B, N, n_cls)
        assert jnp.allclose(oi, ref, atol=2e-2, rtol=2e-2), float(
            jnp.max(jnp.abs(oi - ref)))

    print("KERNEL_OK")
</pallas_src>

<mosaic_0001>
module attributes {stable_mosaic.version = 11 : i64} {
  func.func @_linear_kernel(%arg0: i32, %arg1: i32, %arg2: memref<8x32xf32, #tpu.memory_space<vmem>>, %arg3: memref<32x10xf32, #tpu.memory_space<vmem>>, %arg4: memref<1x10xf32, #tpu.memory_space<vmem>>, %arg5: memref<8x10xf32, #tpu.memory_space<vmem>>) attributes {dimension_semantics = [#tpu.dimension_semantics<parallel>, #tpu.dimension_semantics<parallel>], iteration_bounds = array<i64: 2, 1>, scalar_prefetch = 0 : i64, scratch_operands = 0 : i64, tpu.core_type = #tpu.core_type<tc>, window_params = [{transform_indices = @transform_0, window_bounds = array<i64: 8, 32>}, {transform_indices = @transform_1, window_bounds = array<i64: 32, 10>}, {transform_indices = @transform_2, window_bounds = array<i64: 1, 10>}, {transform_indices = @transform_3, window_bounds = array<i64: 8, 10>}]} {
    %c0 = arith.constant 0 : index
    %c0_0 = arith.constant 0 : index
    %0 = vector.load %arg2[%c0, %c0_0] : memref<8x32xf32, #tpu.memory_space<vmem>>, vector<8x32xf32>
    %1 = arith.truncf %0 : vector<8x32xf32> to vector<8x32xbf16>
    %c0_1 = arith.constant 0 : index
    %c0_2 = arith.constant 0 : index
    %2 = vector.load %arg3[%c0_1, %c0_2] : memref<32x10xf32, #tpu.memory_space<vmem>>, vector<32x10xf32>
    %3 = arith.truncf %2 : vector<32x10xf32> to vector<32x10xbf16>
    %cst = arith.constant dense<0.000000e+00> : vector<8x10xf32>
    %4 = tpu.matmul %1, %3, %cst {dimension_numbers = #tpu.dot_dimension_numbers<[1], [0], [0], [1], [0, 0, 1, 1], [], []>} : vector<8x32xbf16>, vector<32x10xbf16>, vector<8x10xf32> -> vector<8x10xf32>
    %c0_3 = arith.constant 0 : index
    %c0_4 = arith.constant 0 : index
    %5 = vector.load %arg4[%c0_3, %c0_4] : memref<1x10xf32, #tpu.memory_space<vmem>>, vector<1x10xf32>
    %6 = vector.broadcast %5 : vector<1x10xf32> to vector<8x10xf32>
    %7 = arith.addf %4, %6 : vector<8x10xf32>
    %c0_5 = arith.constant 0 : index
    %c0_6 = arith.constant 0 : index
    %8 = vector.load %arg5[%c0_5, %c0_6] : memref<8x10xf32, #tpu.memory_space<vmem>>, vector<8x10xf32>
    tpu.vector_store %arg5[%c0_5, %c0_6], %7 {strides = array<i32>} : memref<8x10xf32, #tpu.memory_space<vmem>>, vector<8x10xf32>,
    return
  }
  func.func @transform_0(%arg0: i32, %arg1: i32) -> (i32, i32) {
    %c0_i32 = arith.constant 0 : i32
    %c0_i32_0 = arith.constant 0 : i32
    return %arg0, %c0_i32 : i32, i32
  }
  func.func @transform_1(%arg0: i32, %arg1: i32) -> (i32, i32) {
    %c0_i32 = arith.constant 0 : i32
    %c0_i32_0 = arith.constant 0 : i32
    return %c0_i32, %arg1 : i32, i32
  }
  func.func @transform_2(%arg0: i32, %arg1: i32) -> (i32, i32) {
    %c0_i32 = arith.constant 0 : i32
    %c0_i32_0 = arith.constant 0 : i32
    return %c0_i32, %arg1 : i32, i32
  }
  func.func @transform_3(%arg0: i32, %arg1: i32) -> (i32, i32) {
    %c0_i32 = arith.constant 0 : i32
    return %arg0, %arg1 : i32, i32
  }
}

</mosaic_0001>

<bundles_post_ra>
// kernel: _linear_2d.1
= control target key start
LH: loop header
LB: loop body
LE: loop exit
PB: predicated region body
PF: predicated region fallthrough
CT: control target
= control target key end

     0   :  { %8 = vsyncpa [#allocation3], 0  ;;  %s696_s0 = inlined_call_operand.vmem [shape: f32[16,32], index: 0, kind: input, shape index: {}]   ;;  %s697_s1 = inlined_call_operand.vmem [shape: f32[32,10], index: 1, kind: input, shape index: {}]   ;;  %s698_s2 = inlined_call_operand.vmem [shape: f32[1,10], index: 2, kind: input, shape index: {}]   ;;  %s699_s3 = inlined_call_operand.hbm [shape: f32[16,10], index: 3, kind: output, shape index: {}]  }
   0x1   :  { %10 = vsyncpa [#allocation3 + $0x1], 0  ;;  %s569_s12 = smov 0   ;;  %s571_s13 = smov 0  }
   0x2   :  { %s573_s14 = smov 0   ;;  %s575_s15 = smov 0  }
   0x3   :  { %s577_s16 = smov 0   ;;  %s579_s17 = smov 0  }
   0x4 LB: > { %s383_s18 = sadd.s32 4294967295, %s544_s17   ;;  %s384_s19 = sadd.s32 4294967294, %s544_s17   ;;  %s544_s17 = sphi %s579_s17, %s16_s17   ;;  %s540_s16 = sphi %s577_s16, %s706_s16   ;;  %s536_s15 = sphi %s575_s15, %s705_s15   ;;  %s532_s14 = sphi %s573_s14, %s704_s14   ;;  %s528_s13 = sphi %s571_s13, %s703_s13   ;;  %s524_s12 = sphi %s569_s12, %s702_s12  }
   0x5   : > { %s28_s20 = sadd.s32 1, %s540_s16  ;;  %s115_s21 = sadd.s32 1, %s532_s14 }
   0x6   : > { %p30_p0 = scmp.ge.s32.totalorder %s28_s20, 2  ;;  %p125_p1 = scmp.ne.s32.totalorder %s532_s14, %s528_s13 }
   0x7   : > { %p126_p2 = scmp.eq.s32.totalorder %s383_s18, 1  ;;  %p131_p3 = scmp.ne.s32.totalorder %s528_s13, %s524_s12 }
   0x8   : > { %s708_s20 = smov (%p30_p0, %s28_s20), 0  ;;  %p132_p5 = scmp.eq.s32.totalorder %s384_s19, 1 }
   0x9   : > { %p609_p4 = por %p126_p2, %p125_p1  ;;  %s110_s23 = ssub.s32 %s540_s16, %s708_s20 }
   0xa   : > { %p389_p6 = scmp.ge.s32.totalorder %s544_s17, 1  ;;  %p113_p7 = scmp.eq.s32.totalorder %s110_s23, 0 }
   0xb   : > { %p616_p8 = por %p132_p5, %p131_p3  ;;  %p170_p9 = scmp.lt.s32.totalorder %s544_s17, 3 }
   0xc   : > { %s622_s25 = scalar_select %p113_p7, %s532_s14, %s115_s21  }
   0xd   : > { %p171_p10 = pnand %p389_p6, %p170_p9 }
   0xe   : > { %v214_v0 = vld [vmem:[%s697_s1] sm:$0xff] (!%p171_p10)  ;;  %v215_v1 = vld [vmem:[%s697_s1 + $0x8] sm:$0xff] (!%p171_p10)  ;;  %v216_v2 = vld [vmem:[%s697_s1 + $0x10] sm:$0xff] (!%p171_p10)  ;;  %p200_p11 = scmp.lt.s32.totalorder (!%p171_p10), %s536_s15, 1  ;;  %v546_v3 = vmov (!%p171_p10), 0.0   ;;  %vm547_vm0 = vmmov (!%p171_p10), 0  }
   0xf   : > { %174 = sbr.rel (%p171_p10) target bundleno = 257 (0x101), region = 32  ;;  %401 = vmatprep.subr.bf16.mxu0 (!%p171_p10), %v546_v3  ;;  %v218_v4 = vpack.c.bf16 (!%p171_p10), %v215_v1, %v214_v0  ;;  %v217_v5 = vld [vmem:[%s697_s1 + $0x18] sm:$0xff] (!%p171_p10)  ;;  %405 = vmatprep.mubr.msk.bf16.mxu0 (!%p171_p10), %vm547_vm0, %v546_v3  ;;  %vm227_vm1 = vcmask (!%p171_p10), 261120   ;;  %s197_s18 = sand.u32 (!%p171_p10), 1, %s528_s13   ;;  %v392_v9 = vld [vmem:[%s698_s2] ss:$0 sm:$0xff] (!%p171_p10) }
  0x10   : > { %v219_v6 = vpack.c.bf16 (!%p171_p10), %v217_v5, %v216_v2  ;;  %s390_s19 = sshll.u32 (!%p171_p10), %s197_s18, 3  ;;  %s395_s26 = sshll.u32 (!%p171_p10), %s536_s15, 7  ;;  %vm271_vm2 = vcmask (!%p171_p10), 80896  }
  0x11   : > { %402 = vmatpush3.bf16.msra.mxu0 (!%p171_p10), %v218_v4  ;;  %s199_s27 = scalar_lea.vmem (!%p171_p10), [#allocation2], %s390_s19  ;;  %s649_s4 = scalar_lea.hbm (!%p171_p10), %s699_s3, %s395_s26 }
  0x12   : > { %403 = vmatprep.subr.bf16.mxu0 (!%p171_p10), %v546_v3  ;;  %s288_s28 = sshll.u32 (!%p171_p10), %s199_s27, 4  ;;  %s548_s6 = smov (!%p171_p10), [#allocation2]   ;;  %s651_s28 = int_to_ptr.vmem [resolvable:$true] %s288_s28 }
  0x13   : > { %s466_s5 = scalar_lea.vmem (!%p171_p10), %s651_s28, 128 }
  0x14   : > { %p467_p12 = scmp.ne.s32.totalorder (!%p171_p10), %s651_s28, %s466_s5 }
  0x15   : > { %404 = vmatpush3.bf16.msra.mxu0 (!%p171_p10), %v219_v6 }
  0x16   : > { %s201_s7 = scalar_select %p200_p11, %s536_s15, 1 }
  0x17   : > { %s274_s15 = scalar_lea.sflag [#allocation3], %s197_s18  ;;  %p468_p13 = pnand %p467_p12, %p609_p4 }
  0x18   : > { %s391_s8 = sshll.u32 %s201_s7, 3  ;;  %s470_s7 = sshll.u32 %s548_s6, 4  ;;  %s471_s7 = int_to_ptr.vmem [resolvable:$false] %s470_s7 }
  0x19   : > { %s203_s11 = scalar_lea.vmem %s696_s0, %s391_s8  ;;  %p469_p0 = pneg %p468_p13 }
  0x1a   : > { %v212_v7 = vld [vmem:[%s203_s11] sm:$0xff]  ;;  %s472_s8 = scalar_lea.vmem %s471_s7, 256  ;;  %p473_p1 = scmp.lt.s32.totalorder %s651_s28, %s471_s7 }
  0x1b   : > { %v213_v8 = vpack.c.bf16 %v212_v7, %v212_v7  ;;  %p474_p2 = scmp.lt.s32.totalorder %s472_s8, %s466_s5 }
  0x1d   : > { %406 = vmatmul.mubr.msk.bf16.vlgmr.msra.gmra.mrb[0].mxu0 %vm227_vm1, %v213_v8  ;;  %p475_p3 = por %p474_p2, %p473_p1 }
  0x1f   : > { %p476_p5 = pnand %p475_p3, %p469_p0 }
  0xf0   : > { %v265_v10 = vpop.f32.mrb[0].mxu0 }
  0xf1   : > { %v266_v11 = vadd.f32 %v392_v9, %v265_v10  ;;  %v407_v12 = vpop.f32.mrb[1].mxu0 }
  0xf2   : > { %v268_v13 = vpop.f32.mrb[2].mxu0 }
  0xf3   : > { %v408_v14 = vpop.f32.mrb[3].mxu0  ;;  %272 = vst.msk [vmem:[%s199_s27] sm:$0xff] %vm271_vm2, %v266_v11 }
  0xf4   : > { %479 = shalt.err (!%p476_p5)
}
  0xf5   : > { %s480_s9 = scalar_lea.hbm %s649_s4, 128  ;;  %s484_s18 = scalar_lea.hbm %s699_s3, 256 }
  0xf6   : > { %p481_p6 = scmp.ne.s32.totalorder %s649_s4, %s480_s9  ;;  %p485_p10 = scmp.lt.u32.totalorder %s649_s4, %s699_s3 }
  0xf7   : > { %p486_p11 = scmp.lt.u32.totalorder %s484_s18, %s480_s9  ;;  %p488_p13 = scmp.lt.u32.totalorder %s480_s9, %s649_s4 }
  0xf8   : > { %p482_p7 = pnand %p481_p6, %p609_p4 }
  0xf9   : > { %p487_p12 = por %p486_p11, %p485_p10 }
  0xfa   : > { %p483_p9 = pneg %p482_p7 }
  0xfb   : > { %p489_p0 = por %p488_p13, %p487_p12 }
  0xfd   : > { %p490_p1 = pnand %p489_p0, %p483_p9 }
  0xff   : > { %493 = shalt.err (!%p490_p1)
}
 0x100   : > { %409 = dma.vmem_to_hbm [thread:$0]  (%p609_p4), %s651_s28, 128, %s649_s4, %s274_s15  }
 0x101 PF: > { %p415_p2 = scmp.ge.s32.totalorder %s544_s17, 2  ;;  %s300_s23 = sand.u32 1, %s524_s12  }
 0x102   : > { %s301_s26 = scalar_lea.sflag [#allocation3], %s300_s23 }
 0x103   : > { %p412_p3 = pnand %p415_p2, %p616_p8 }
 0x105   : > { %519 = dma.done.wait (!%p412_p3), %s301_s26, 128  }
 0x106   : > { %521 = vsyncadd (!%p412_p3), %s301_s26, 4294967168  ;;  %s16_s17 = sadd.s32 1, %s544_s17   ;;  %s702_s12 = smov %s528_s13 }
 0x107   : > { %p13_p5 = scmp.ge.s32.totalorder %s16_s17, 4   ;;  %s703_s13 = smov %s532_s14 }
 0x108   : > { %s704_s14 = smov %s622_s25  ;;  %s705_s15 = smov %s540_s16 }
 0x109   : > { %s706_s16 = smov %s708_s20  ;;  %15 = sbr.rel (!%p13_p5) target bundleno = 4 (0x4), region = 73 }
 0x110   :  { %306 = vsyncpa [#allocation3], 1 }
 0x111   :  { %308 = vsyncpa [#allocation3 + $0x1], 1 }

</bundles_post_ra>
